<compile_context>
chip_gen: v7x
topology: tpu7x:2x2x1
jax: 0.10.0
libtpu: 0.0.40
codegen_flags: <defaults>
</compile_context>

<pallas_src>
import math

import jax
import jax.numpy as jnp
from jax.experimental import pallas as pl
from jax.experimental.pallas import tpu as pltpu


def pointer_kernel(edge_ref, q_ref, wt_ref, vblk_ref, mask_ref, scores_ref):
    """Fused Pointer forward for one batch tile.

    edge_ref  : (tb, E*d_unit)       flattened edge embeddings (native dtype)
    q_ref     : (tb, d_query)        query vectors (native dtype)
    wt_ref    : (d_query, E*d_unit)  w_l^T tiled E times along columns (f32, resident)
    vblk_ref  : (E*d_unit, E)        block-diagonal of v (f32, resident)
    mask_ref  : (tb, E)              flattened mask (0 == masked, native dtype)
    scores_ref: (tb, E)              output scores (f32)
    """
    # w_l(query), already broadcast over the E edges: one small MXU matmul.
    q_proj = jnp.dot(q_ref[...].astype(jnp.float32), wt_ref[...],
                     preferred_element_type=jnp.float32)            # (tb, E*d_unit)

    # Lane-dense add + tanh (VPU/EUP); the sum over d_unit weighted by v is a
    # block-diagonal matmul on the MXU (removes the cross-lane XLU reduce).
    u = jnp.tanh(edge_ref[...].astype(jnp.float32) + q_proj)        # (tb, E*d_unit)
    s = jnp.dot(u, vblk_ref[...], preferred_element_type=jnp.float32)  # (tb, E)
    s = 10.0 * jnp.tanh(s)

    # Mask handling: scores[mask == 0] = -inf; rows that are fully masked get
    # scores[:, 0] = 0 so a downstream softmax stays finite.
    is_masked = mask_ref[...] == 0
    masked_scores = jnp.where(is_masked, -jnp.inf, s)
    num_valid = jnp.sum(jnp.where(is_masked, 0.0, 1.0), axis=-1, keepdims=True)
    row_all_masked = num_valid == 0.0                                # (tb, 1)
    col0 = jax.lax.broadcasted_iota(jnp.int32, masked_scores.shape, 1) == 0
    scores_ref[...] = jnp.where(row_all_masked & col0, 0.0,
                                masked_scores).astype(scores_ref.dtype)


def _sublane(dtype):
    """Sublane packing multiple for a dtype (8 for 4-byte, 16 for 2-byte, ...)."""
    return max(8, 32 // jnp.dtype(dtype).itemsize)


def _pick_batch_tile(batch, row_bytes, sublane, *,
                     max_tile_bytes=2 << 20, max_tile_rows=2048):
    """Pick the batch tile (rows per grid step).

    Largest tile that (a) divides `batch`, (b) is a multiple of the sublane
    packing (or equals the full batch), (c) keeps the per-buffer edge block
    under `max_tile_bytes` (~2 MiB blocks reach ~85%+ of HBM BW while the
    double-buffered blocks stay well inside every generation's VMEM budget),
    and (d) leaves at least two grid steps whenever possible so both v7x
    TensorCores get work and DMA overlaps compute.
    """
    cap_rows = max(1, min(max_tile_rows, max_tile_bytes // max(row_bytes, 1)))
    if batch < 2 * sublane:
        return batch                        # tiny batch: a single full block
    cands = [t for t in range(sublane, min(batch, cap_rows) + 1, sublane)
             if batch % t == 0]
    two_step = [t for t in cands if batch // t >= 2]
    if two_step:
        return two_step[-1]
    if cands:
        return cands[-1]
    # Awkward batch (no multiple-of-sublane divisor): full batch if it fits,
    # else the largest divisor under the cap (Pallas pads the sublanes).
    if batch <= cap_rows:
        return batch
    divs = [t for t in range(1, cap_rows + 1) if batch % t == 0]
    return divs[-1]


def pointer_forward(edge_emb, query, w_l, v, mask, *,
                    max_tile_bytes=2 << 20, max_tile_rows=2048):
    """Pallas forward equivalent of Pointer.forward.

    edge_emb: (B, E, d_unit)
    query   : (B, d_query)
    w_l     : (d_unit, d_query)  nn.Linear(d_query, d_unit, bias=False) weight
    v       : (d_unit,)
    mask    : (B, ...) reshaping to (B, E); 0 marks masked entries (required)
    Returns (scores (B, E) float32,
             t2 (B,) int32 indices of fully-masked rows, padded with -1).
    """
    B, E, d_unit = edge_emb.shape
    d_query = query.shape[-1]

    # Free contiguous reshapes; big operands keep their native dtype through
    # the DMA (the f32 upcast happens inside the kernel, in registers).
    edge_flat = edge_emb.reshape(B, E * d_unit)
    m2 = mask.reshape(B, -1)
    assert m2.shape == (B, E), "mask must reshape to (batch, n_edges)"

    # Small resident operands (a few KB), prepared once in f32:
    #   wt_tiled[k, e*d_unit + d] = w_l.T[k, d]   -> q @ wt_tiled == broadcast proj
    #   vblk[e*d_unit + d, e']    = (e == e')*v[d] -> u @ vblk == sum_d v[d]*u[:,e',d]
    wt_tiled = jnp.tile(w_l.T.astype(jnp.float32), (1, E))           # (d_query, E*d_unit)
    vf = v.astype(jnp.float32)
    vblk = (jnp.eye(E, dtype=jnp.float32)[:, None, :]
            * vf[None, :, None]).reshape(E * d_unit, E)              # (E*d_unit, E)

    row_bytes = E * d_unit * jnp.dtype(edge_emb.dtype).itemsize
    sublane = max(_sublane(edge_emb.dtype), _sublane(query.dtype), _sublane(m2.dtype))
    tb = _pick_batch_tile(B, row_bytes, sublane,
                          max_tile_bytes=max_tile_bytes, max_tile_rows=max_tile_rows)
    num_tiles = B // tb

    scores = pl.pallas_call(
        pointer_kernel,
        out_shape=jax.ShapeDtypeStruct((B, E), jnp.float32),
        grid_spec=pltpu.PrefetchScalarGridSpec(
            num_scalar_prefetch=0,
            grid=(num_tiles,),
            in_specs=[
                pl.BlockSpec((tb, E * d_unit), lambda i: (i, 0)),     # edge (flattened)
                pl.BlockSpec((tb, d_query), lambda i: (i, 0)),        # query
                pl.BlockSpec((d_query, E * d_unit), lambda i: (0, 0)),  # wt_tiled (resident)
                pl.BlockSpec((E * d_unit, E), lambda i: (0, 0)),      # vblk (resident)
                pl.BlockSpec((tb, E), lambda i: (i, 0)),              # mask
            ],
            out_specs=pl.BlockSpec((tb, E), lambda i: (i, 0)),
        ),
        compiler_params=pltpu.CompilerParams(
            # No cross-tile state -> the batch axis can be sharded across cores.
            dimension_semantics=("parallel",),
            # Explicit limit: double-buffered ~2 MiB edge blocks plus the f32
            # intermediate stay far below this on every generation (v5e's
            # default scoped limit is only 16 MiB).
            vmem_limit_bytes=32 * 1024 * 1024,
        ),
    )(edge_flat, query, wt_tiled, vblk, m2)

    # t2 = torch.where(all(mask == 0, dim=1))[0] has a data-dependent shape.
    # TODO(synk): dynamic-shape torch.where has no exact JAX equivalent; we
    # return a fixed-size index vector padded with -1 for rows that are valid.
    t1 = jnp.all(m2 == 0, axis=1)
    t2 = jnp.nonzero(t1, size=B, fill_value=-1)[0].astype(jnp.int32)
    return scores, t2


def pointer_reference(edge_emb, query, w_l, v, mask):
    """Plain-JAX reference mirroring the PyTorch forward."""
    B, E, _ = edge_emb.shape
    q_proj = query @ w_l.T                                           # (B, d_unit)
    s = jnp.sum(v * jnp.tanh(edge_emb + q_proj[:, None, :]), axis=-1)
    s = 10.0 * jnp.tanh(s)
    m = mask.reshape(B, -1)
    s = jnp.where(m == 0, -jnp.inf, s)
    t1 = jnp.all(m == 0, axis=1)
    col0 = jnp.arange(E) == 0
    s = jnp.where(t1[:, None] & col0[None, :], 0.0, s)
    t2 = jnp.nonzero(t1, size=B, fill_value=-1)[0].astype(jnp.int32)
    return s, t2


if __name__ == "__main__":
    # Small shapes consistent with the module: edge_emb (B, deg*deg, d_unit),
    # query (B, d_query), mask (B, deg, deg) -> scores (B, deg*deg).
    B, deg, d_unit, d_query = 2, 4, 32, 32
    E = deg * deg

    key = jax.random.PRNGKey(0)
    ke, kq, kw, kv, km = jax.random.split(key, 5)

    edge_emb = jax.random.normal(ke, (B, E, d_unit), dtype=jnp.float32)
    query = jax.random.normal(kq, (B, d_query), dtype=jnp.float32)
    # nn.Linear(d_query, d_unit, bias=False) weight: (d_unit, d_query)
    w_l = jax.random.normal(kw, (d_unit, d_query), dtype=jnp.float32) * (1.0 / math.sqrt(d_query))
    bound = 1.0 / math.sqrt(d_unit)
    v = jax.random.uniform(kv, (d_unit,), minval=-bound, maxval=bound, dtype=jnp.float32)

    # Mask: batch 0 partially masked (exercises -inf), batch 1 fully masked
    # (exercises the scores[t2, 0] = 0 path).
    mask = (jax.random.uniform(km, (B, deg, deg)) > 0.3).astype(jnp.float32)
    mask = mask.at[0, 0, 0].set(1.0)   # ensure batch 0 is not fully masked
    mask = mask.at[0, 0, 1].set(0.0)   # ensure batch 0 has at least one masked slot
    mask = mask.at[1].set(0.0)         # batch 1 fully masked

    scores, t2 = pointer_forward(edge_emb, query, w_l, v, mask)
    scores = jax.block_until_ready(scores)

    ref_scores, ref_t2 = pointer_reference(edge_emb, query, w_l, v, mask)
    assert scores.shape == (B, E)
    assert jnp.allclose(scores, ref_scores, atol=2e-3, rtol=2e-3), "scores mismatch vs reference"
    assert jnp.array_equal(t2, ref_t2), "t2 mismatch vs reference"

    print("KERNEL_OK")
</pallas_src>

<mosaic_0001>
module attributes {stable_mosaic.version = 11 : i64} {
  func.func @pointer_kernel(%arg0: i32, %arg1: memref<2x512xf32, #tpu.memory_space<vmem>>, %arg2: memref<2x32xf32, #tpu.memory_space<vmem>>, %arg3: memref<32x512xf32, #tpu.memory_space<vmem>>, %arg4: memref<512x16xf32, #tpu.memory_space<vmem>>, %arg5: memref<2x16xf32, #tpu.memory_space<vmem>>, %arg6: memref<2x16xf32, #tpu.memory_space<vmem>>) attributes {dimension_semantics = [#tpu.dimension_semantics<parallel>], iteration_bounds = array<i64: 1>, scalar_prefetch = 0 : i64, scratch_operands = 0 : i64, tpu.core_type = #tpu.core_type<tc>, window_params = [{transform_indices = @transform_0, window_bounds = array<i64: 2, 512>}, {transform_indices = @transform_1, window_bounds = array<i64: 2, 32>}, {pipeline_mode = #tpu.pipeline_mode<synchronous>, transform_indices = @transform_2, window_bounds = array<i64: 32, 512>}, {pipeline_mode = #tpu.pipeline_mode<synchronous>, transform_indices = @transform_3, window_bounds = array<i64: 512, 16>}, {transform_indices = @transform_4, window_bounds = array<i64: 2, 16>}, {transform_indices = @transform_5, window_bounds = array<i64: 2, 16>}]} {
    %c0 = arith.constant 0 : index
    %c0_0 = arith.constant 0 : index
    %0 = vector.load %arg2[%c0, %c0_0] : memref<2x32xf32, #tpu.memory_space<vmem>>, vector<2x32xf32>
    %c0_1 = arith.constant 0 : index
    %c0_2 = arith.constant 0 : index
    %1 = vector.load %arg3[%c0_1, %c0_2] : memref<32x512xf32, #tpu.memory_space<vmem>>, vector<32x512xf32>
    %cst = arith.constant dense<0.000000e+00> : vector<2x512xf32>
    %2 = tpu.matmul %0, %1, %cst {dimension_numbers = #tpu.dot_dimension_numbers<[1], [0], [0], [1], [0, 0, 1, 1], [], []>} : vector<2x32xf32>, vector<32x512xf32>, vector<2x512xf32> -> vector<2x512xf32>
    %c0_3 = arith.constant 0 : index
    %c0_4 = arith.constant 0 : index
    %3 = vector.load %arg1[%c0_3, %c0_4] : memref<2x512xf32, #tpu.memory_space<vmem>>, vector<2x512xf32>
    %4 = arith.addf %3, %2 : vector<2x512xf32>
    %5 = math.tanh %4 : vector<2x512xf32>
    %c0_5 = arith.constant 0 : index
    %c0_6 = arith.constant 0 : index
    %6 = vector.load %arg4[%c0_5, %c0_6] : memref<512x16xf32, #tpu.memory_space<vmem>>, vector<512x16xf32>
    %cst_7 = arith.constant dense<0.000000e+00> : vector<2x16xf32>
    %7 = tpu.matmul %5, %6, %cst_7 {dimension_numbers = #tpu.dot_dimension_numbers<[1], [0], [0], [1], [0, 0, 1, 1], [], []>} : vector<2x512xf32>, vector<512x16xf32>, vector<2x16xf32> -> vector<2x16xf32>
    %8 = math.tanh %7 : vector<2x16xf32>
    %cst_8 = arith.constant 1.000000e+01 : f32
    %9 = vector.broadcast %cst_8 : f32 to vector<2x16xf32>
    %10 = arith.mulf %9, %8 : vector<2x16xf32>
    %c0_9 = arith.constant 0 : index
    %c0_10 = arith.constant 0 : index
    %11 = vector.load %arg5[%c0_9, %c0_10] : memref<2x16xf32, #tpu.memory_space<vmem>>, vector<2x16xf32>
    %cst_11 = arith.constant 0.000000e+00 : f32
    %12 = vector.broadcast %cst_11 : f32 to vector<2x16xf32>
    %13 = arith.cmpf oeq, %11, %12 : vector<2x16xf32>
    %cst_12 = arith.constant 0xFF800000 : f32
    %14 = vector.broadcast %cst_12 : f32 to vector<2x16xf32>
    %15 = arith.select %13, %14, %10 : vector<2x16xi1>, vector<2x16xf32>
    %cst_13 = arith.constant 0.000000e+00 : f32
    %cst_14 = arith.constant 1.000000e+00 : f32
    %16 = vector.broadcast %cst_13 : f32 to vector<2x16xf32>
    %17 = vector.broadcast %cst_14 : f32 to vector<2x16xf32>
    %18 = arith.select %13, %16, %17 : vector<2x16xi1>, vector<2x16xf32>
    %cst_15 = arith.constant dense<0.000000e+00> : vector<2xf32>
    %19 = vector.multi_reduction <add>, %18, %cst_15 [1] : vector<2x16xf32> to vector<2xf32>
    %20 = vector.shape_cast %19 : vector<2xf32> to vector<2x1xf32>
    %cst_16 = arith.constant 0.000000e+00 : f32
    %21 = vector.broadcast %cst_16 : f32 to vector<2x1xf32>
    %22 = arith.cmpf oeq, %20, %21 : vector<2x1xf32>
    %23 = tpu.iota {dimensions = array<i32: 1>} : vector<2x16xi32>
    %c0_i32 = arith.constant 0 : i32
    %24 = vector.broadcast %c0_i32 : i32 to vector<2x16xi32>
    %25 = arith.cmpi eq, %23, %24 : vector<2x16xi32>
    %26 = vector.broadcast %22 : vector<2x1xi1> to vector<2x16xi1>
    %27 = arith.andi %26, %25 : vector<2x16xi1>
    %cst_17 = arith.constant 0.000000e+00 : f32
    %28 = vector.broadcast %cst_17 : f32 to vector<2x16xf32>
    %29 = arith.select %27, %28, %15 : vector<2x16xi1>, vector<2x16xf32>
    %c0_18 = arith.constant 0 : index
    %c0_19 = arith.constant 0 : index
    %30 = vector.load %arg6[%c0_18, %c0_19] : memref<2x16xf32, #tpu.memory_space<vmem>>, vector<2x16xf32>
    tpu.vector_store %arg6[%c0_18, %c0_19], %29 {strides = array<i32>} : memref<2x16xf32, #tpu.memory_space<vmem>>, vector<2x16xf32>,
    return
  }
  func.func @transform_0(%arg0: i32) -> (i32, i32) {
    %c0_i32 = arith.constant 0 : i32
    %c0_i32_0 = arith.constant 0 : i32
    return %arg0, %c0_i32 : i32, i32
  }
  func.func @transform_1(%arg0: i32) -> (i32, i32) {
    %c0_i32 = arith.constant 0 : i32
    %c0_i32_0 = arith.constant 0 : i32
    return %arg0, %c0_i32 : i32, i32
  }
  func.func @transform_2(%arg0: i32) -> (i32, i32) {
    %c0_i32 = arith.constant 0 : i32
    %c0_i32_0 = arith.constant 0 : i32
    %c0_i32_1 = arith.constant 0 : i32
    return %c0_i32, %c0_i32_0 : i32, i32
  }
  func.func @transform_3(%arg0: i32) -> (i32, i32) {
    %c0_i32 = arith.constant 0 : i32
    %c0_i32_0 = arith.constant 0 : i32
    %c0_i32_1 = arith.constant 0 : i32
    return %c0_i32, %c0_i32_0 : i32, i32
  }
  func.func @transform_4(%arg0: i32) -> (i32, i32) {
    %c0_i32 = arith.constant 0 : i32
    %c0_i32_0 = arith.constant 0 : i32
    return %arg0, %c0_i32 : i32, i32
  }
  func.func @transform_5(%arg0: i32) -> (i32, i32) {
    %c0_i32 = arith.constant 0 : i32
    %c0_i32_0 = arith.constant 0 : i32
    return %arg0, %c0_i32 : i32, i32
  }
}

</mosaic_0001>

<bundles_post_ra>
// kernel: tpu_custom_call.1
= control target key start
LH: loop header
LB: loop body
LE: loop exit
PB: predicated region body
PF: predicated region fallthrough
CT: control target
= control target key end

     0   :  { %v652_v7 = vmov 0.0   ;;  %vm38_vm0 = vcmask 261120   ;;  %s951_s0 = inlined_call_operand.vmem [shape: f32[2,512], index: 0, kind: input, shape index: {}]   ;;  %s952_s1 = inlined_call_operand.vmem [shape: f32[2,32], index: 1, kind: input, shape index: {}]   ;;  %s953_s2 = inlined_call_operand.vmem [shape: f32[32,512], index: 2, kind: input, shape index: {}]   ;;  %s954_s3 = inlined_call_operand.vmem [shape: f32[512,16], index: 3, kind: input, shape index: {}]   ;;  %s955_s4 = inlined_call_operand.vmem [shape: f32[2,16], index: 4, kind: input, shape index: {}]   ;;  %s956_s5 = inlined_call_operand.hbm [shape: f32[2,16], index: 5, kind: output, shape index: {}]  }
   0x1   :  { %v23_v0 = vld [vmem:[%s953_s2 + $0x8] sm:$0xff]  ;;  %v25_v2 = vld [vmem:[%s953_s2 + $0x18] sm:$0xff]  ;;  %v22_v5 = vld [vmem:[%s953_s2] sm:$0xff]  ;;  %106 = vmatprep.mubr.f32.mxu0 %v652_v7  ;;  %177 = vmatprep.mubr.f32.mxu1 %v652_v7 }
   0x2   :  { %v27_v1 = vld [vmem:[%s953_s2 + $0x28] sm:$0xff]  ;;  %v29_v4 = vld [vmem:[%s953_s2 + $0x38] sm:$0xff]  ;;  %v26_v6 = vld [vmem:[%s953_s2 + $0x20] sm:$0xff] }
   0x3   :  { %v540_v3 = vpack.c.bf16 %v27_v1, %v23_v0  ;;  %v548_v8 = vpack.c.bf16 %v29_v4, %v25_v2  ;;  %v542_v9 = vpack.c.bf16 %v26_v6, %v22_v5  ;;  %v24_v10 = vld [vmem:[%s953_s2 + $0x10] sm:$0xff]  ;;  %v31_v12 = vld [vmem:[%s953_s2 + $0x48] sm:$0xff]  ;;  %v33_v15 = vld [vmem:[%s953_s2 + $0x58] sm:$0xff] }
   0x4   :  { %v28_v11 = vld [vmem:[%s953_s2 + $0x30] sm:$0xff]  ;;  %v35_v14 = vld [vmem:[%s953_s2 + $0x68] sm:$0xff]  ;;  %v37_v16 = vld [vmem:[%s953_s2 + $0x78] sm:$0xff] }
   0x5   :  { %541 = vmatprep.subr.bf16.mxu0 %v540_v3  ;;  %v550_v13 = vpack.c.bf16 %v28_v11, %v24_v10  ;;  %549 = vmatprep.subr.bf16.mxu1 %v548_v8  ;;  %v544_v17 = vpack.c.bf16 %v35_v14, %v31_v12  ;;  %v552_v18 = vpack.c.bf16 %v37_v16, %v33_v15  ;;  %v30_v19 = vld [vmem:[%s953_s2 + $0x40] sm:$0xff]  ;;  %v32_v21 = vld [vmem:[%s953_s2 + $0x50] sm:$0xff]  ;;  %v226_v27 = vld [vmem:[%s954_s3 + $0x88] sm:$0xff] }
   0x6   :  { %543 = vmatpush1.bf16.msra.mxu0 %v542_v9  ;;  %v34_v20 = vld [vmem:[%s953_s2 + $0x60] sm:$0xff]  ;;  %v36_v23 = vld [vmem:[%s953_s2 + $0x70] sm:$0xff]  ;;  %v210_v29 = vld [vmem:[%s954_s3 + $0x8] sm:$0xff] }
   0x7   :  { %551 = vmatpush1.bf16.msra.mxu1 %v550_v13  ;;  %v546_v22 = vpack.c.bf16 %v34_v20, %v30_v19  ;;  %v225_v24 = vld [vmem:[%s954_s3 + $0x80] sm:$0xff]  ;;  %545 = vmatprep.subr.bf16.mxu0 %v544_v17  ;;  %v554_v25 = vpack.c.bf16 %v36_v23, %v32_v21  ;;  %v258_v32 = vld [vmem:[%s954_s3 + $0x188] sm:$0xff]  ;;  %v227_v37 = vld [vmem:[%s954_s3 + $0x90] sm:$0xff] }
   0x8   :  { %553 = vmatprep.subr.bf16.mxu1 %v552_v18  ;;  %v21_v26 = vld [vmem:[%s952_s1] sm:$0x3]  ;;  %v556_v30 = vpack.c.bf16 %v226_v27, %v225_v24  ;;  %v242_v36 = vld [vmem:[%s954_s3 + $0x108] sm:$0xff]  ;;  %v228_v38 = vld [vmem:[%s954_s3 + $0x98] sm:$0xff] }
   0x9   :  { %v209_v28 = vld [vmem:[%s954_s3] sm:$0xff]  ;;  %v560_v40 = vpack.c.bf16 %v228_v38, %v227_v37  ;;  %v211_v41 = vld [vmem:[%s954_s3 + $0x10] sm:$0xff]  ;;  %v212_v42 = vld [vmem:[%s954_s3 + $0x18] sm:$0xff] }
   0xa   :  { %v257_v31 = vld [vmem:[%s954_s3 + $0x180] sm:$0xff]  ;;  %547 = vmatpush1.bf16.msra.mxu0 %v546_v22  ;;  %v558_v34 = vpack.c.bf16 %v210_v29, %v209_v28 }
   0xb   :  { %v241_v33 = vld [vmem:[%s954_s3 + $0x100] sm:$0xff]  ;;  %v588_v35 = vpack.c.bf16 %v258_v32, %v257_v31  ;;  %555 = vmatpush1.bf16.msra.mxu1 %v554_v25  ;;  %557 = vmatprep.subr.bf16.mxu0 %v556_v30 }
   0xc   :  { %v590_v39 = vpack.c.bf16 %v242_v36, %v241_v33 }
   0xd   :  { %10 = vsyncpa [#allocation3], 0  ;;  %589 = vmatprep.subr.bf16.mxu1 %v588_v35  ;;  %468 = vmatmul.mubr.msk.f32.vlgmr.msra.gmra.mrb[0].mxu0 %vm38_vm0, %v21_v26  ;;  %v562_v43 = vpack.c.bf16 %v212_v42, %v211_v41  ;;  %v259_v44 = vld [vmem:[%s954_s3 + $0x190] sm:$0xff]  ;;  %v260_v45 = vld [vmem:[%s954_s3 + $0x198] sm:$0xff]  ;;  %vm441_vm1 = vcmask 123904  }
   0xe   :  { %469 = vmatmul.mubr.msk.f32.vlgmr.msra.gmra.mrb[0].mxu1 %vm38_vm0, %v21_v26  ;;  %559 = vmatpush3.bf16.msra.mxu0 %v558_v34  ;;  %v592_v46 = vpack.c.bf16 %v260_v45, %v259_v44  ;;  %v243_v47 = vld [vmem:[%s954_s3 + $0x110] sm:$0xff]  ;;  %v244_v48 = vld [vmem:[%s954_s3 + $0x118] sm:$0xff]  ;;  %v229_v50 = vld [vmem:[%s954_s3 + $0xa0] sm:$0xff] }
   0xf   :  { %591 = vmatpush3.bf16.msra.mxu1 %v590_v39  ;;  %561 = vmatprep.subr.bf16.mxu0 %v560_v40  ;;  %v594_v49 = vpack.c.bf16 %v244_v48, %v243_v47  ;;  %v230_v51 = vld [vmem:[%s954_s3 + $0xa8] sm:$0xff]  ;;  %v213_v53 = vld [vmem:[%s954_s3 + $0x20] sm:$0xff]  ;;  %v231_v62 = vld [vmem:[%s954_s3 + $0xb0] sm:$0xff] }
  0x10   :  { %593 = vmatprep.subr.bf16.mxu1 %v592_v46  ;;  %v564_v52 = vpack.c.bf16 %v230_v51, %v229_v50  ;;  %v214_v54 = vld [vmem:[%s954_s3 + $0x28] sm:$0xff]  ;;  %v261_v56 = vld [vmem:[%s954_s3 + $0x1a0] sm:$0xff]  ;;  %v232_v63 = vld [vmem:[%s954_s3 + $0xb8] sm:$0xff] }
  0x11   :  { %v566_v55 = vpack.c.bf16 %v214_v54, %v213_v53  ;;  %v262_v57 = vld [vmem:[%s954_s3 + $0x1a8] sm:$0xff]  ;;  %v245_v59 = vld [vmem:[%s954_s3 + $0x120] sm:$0xff]  ;;  %v568_v0 = vpack.c.bf16 %v232_v63, %v231_v62  ;;  %v215_v1 = vld [vmem:[%s954_s3 + $0x30] sm:$0xff]  ;;  %v654_v62 = vmov 1983009808  }
  0x12   :  { %563 = vmatpush3.bf16.msra.mxu0 %v562_v43  ;;  %v596_v58 = vpack.c.bf16 %v262_v57, %v261_v56  ;;  %v246_v60 = vld [vmem:[%s954_s3 + $0x128] sm:$0xff]  ;;  %v216_v2 = vld [vmem:[%s954_s3 + $0x38] sm:$0xff]  ;;  %v263_v4 = vld [vmem:[%s954_s3 + $0x1b0] sm:$0xff]  ;;  %v192_v63 = vunpack.c.l.s4 %v654_v62 }
  0x13   :  { %595 = vmatpush3.bf16.msra.mxu1 %v594_v49  ;;  %565 = vmatprep.subr.bf16.mxu0 %v564_v52  ;;  %v598_v61 = vpack.c.bf16 %v246_v60, %v245_v59  ;;  %v570_v3 = vpack.c.bf16 %v216_v2, %v215_v1  ;;  %v264_v5 = vld [vmem:[%s954_s3 + $0x1b8] sm:$0xff]  ;;  %v247_v7 = vld [vmem:[%s954_s3 + $0x130] sm:$0xff]  ;;  %v233_v10 = vld [vmem:[%s954_s3 + $0xc0] sm:$0xff]  ;;  %v653_v59 = vmov 1.0  }
  0x14   :  { %597 = vmatprep.subr.bf16.mxu1 %v596_v58  ;;  %v600_v6 = vpack.c.bf16 %v264_v5, %v263_v4  ;;  %v248_v8 = vld [vmem:[%s954_s3 + $0x138] sm:$0xff]  ;;  %v234_v11 = vld [vmem:[%s954_s3 + $0xc8] sm:$0xff]  ;;  %v217_v13 = vld [vmem:[%s954_s3 + $0x40] sm:$0xff]  ;;  %v193_v1 = vunpack.c.0.s8 %v192_v63 }
  0x15   :  { %v602_v9 = vpack.c.bf16 %v248_v8, %v247_v7  ;;  %v572_v12 = vpack.c.bf16 %v234_v11, %v233_v10  ;;  %v218_v14 = vld [vmem:[%s954_s3 + $0x48] sm:$0xff]  ;;  %v265_v16 = vld [vmem:[%s954_s3 + $0x1c0] sm:$0xff]  ;;  %v235_v21 = vld [vmem:[%s954_s3 + $0xd0] sm:$0xff] }
  0x16   :  { %567 = vmatpush3.bf16.msra.mxu0 %v566_v55  ;;  %v574_v15 = vpack.c.bf16 %v218_v14, %v217_v13  ;;  %v266_v17 = vld [vmem:[%s954_s3 + $0x1c8] sm:$0xff]  ;;  %v249_v19 = vld [vmem:[%s954_s3 + $0x140] sm:$0xff]  ;;  %v236_v23 = vld [vmem:[%s954_s3 + $0xd8] sm:$0xff] }
  0x17   :  { %599 = vmatpush3.bf16.msra.mxu1 %v598_v61  ;;  %569 = vmatprep.subr.bf16.mxu0 %v568_v0  ;;  %v604_v18 = vpack.c.bf16 %v266_v17, %v265_v16  ;;  %v250_v20 = vld [vmem:[%s954_s3 + $0x148] sm:$0xff]  ;;  %v219_v24 = vld [vmem:[%s954_s3 + $0x50] sm:$0xff]  ;;  %v220_v25 = vld [vmem:[%s954_s3 + $0x58] sm:$0xff]  ;;  %v576_v26 = vpack.c.bf16 %v236_v23, %v235_v21  ;;  %v194_v0 = vlaneseq }
  0x18   :  { %601 = vmatprep.subr.bf16.mxu1 %v600_v6  ;;  %v606_v22 = vpack.c.bf16 %v250_v20, %v249_v19  ;;  %v578_v27 = vpack.c.bf16 %v220_v25, %v219_v24  ;;  %v267_v28 = vld [vmem:[%s954_s3 + $0x1d0] sm:$0xff]  ;;  %v268_v29 = vld [vmem:[%s954_s3 + $0x1d8] sm:$0xff]  ;;  %v237_v33 = vld [vmem:[%s954_s3 + $0xe0] sm:$0xff] }
  0x19   :  { %v251_v30 = vld [vmem:[%s954_s3 + $0x150] sm:$0xff]  ;;  %v608_v31 = vpack.c.bf16 %v268_v29, %v267_v28  ;;  %v252_v32 = vld [vmem:[%s954_s3 + $0x158] sm:$0xff]  ;;  %v238_v34 = vld [vmem:[%s954_s3 + $0xe8] sm:$0xff]  ;;  %v195_v2 = vshrl.u32 %v194_v0, 7  ;;  %v447_v28 = vand.u32 127, %v194_v0 }
  0x1a   :  { %571 = vmatpush3.bf16.msra.mxu0 %v570_v3  ;;  %v610_v35 = vpack.c.bf16 %v252_v32, %v251_v30  ;;  %v580_v36 = vpack.c.bf16 %v238_v34, %v237_v33  ;;  %v221_v37 = vld [vmem:[%s954_s3 + $0x60] sm:$0xff]  ;;  %v222_v38 = vld [vmem:[%s954_s3 + $0x68] sm:$0xff]  ;;  %v239_v45 = vld [vmem:[%s954_s3 + $0xf0] sm:$0xff] }
  0x1b   :  { %603 = vmatpush3.bf16.msra.mxu1 %v602_v9  ;;  %573 = vmatprep.subr.bf16.mxu0 %v572_v12  ;;  %v269_v39 = vld [vmem:[%s954_s3 + $0x1e0] sm:$0xff]  ;;  %v582_v40 = vpack.c.bf16 %v222_v38, %v221_v37  ;;  %v270_v41 = vld [vmem:[%s954_s3 + $0x1e8] sm:$0xff]  ;;  %v240_v46 = vld [vmem:[%s954_s3 + $0xf8] sm:$0xff]  ;;  %v196_v4 = vsub.s32 %v193_v1, %v195_v2  ;;  %vm448_vm4 = vcmp.eq.s32.totalorder %v447_v28, 0 }
  0x1c   :  { %605 = vmatprep.subr.bf16.mxu1 %v604_v18  ;;  %v253_v42 = vld [vmem:[%s954_s3 + $0x160] sm:$0xff]  ;;  %v254_v43 = vld [vmem:[%s954_s3 + $0x168] sm:$0xff]  ;;  %v612_v44 = vpack.c.bf16 %v270_v41, %v269_v39  ;;  %v223_v47 = vld [vmem:[%s954_s3 + $0x70] sm:$0xff]  ;;  %v584_v49 = vpack.c.bf16 %v240_v46, %v239_v45 }
  0x1d   :  { %v614_v48 = vpack.c.bf16 %v254_v43, %v253_v42  ;;  %v224_v50 = vld [vmem:[%s954_s3 + $0x78] sm:$0xff]  ;;  %v271_v51 = vld [vmem:[%s954_s3 + $0x1f0] sm:$0xff]  ;;  %v437_v58 = vld [vmem:[%s955_s4] sm:$0x3] }
  0x1e   :  { %575 = vmatpush3.bf16.msra.mxu0 %v574_v15  ;;  %v272_v52 = vld [vmem:[%s954_s3 + $0x1f8] sm:$0xff]  ;;  %v586_v54 = vpack.c.bf16 %v224_v50, %v223_v47  ;;  %v255_v55 = vld [vmem:[%s954_s3 + $0x170] sm:$0xff]  ;;  %vm438_vm2 = vcmp.eq.f32.partialorder %v437_v58, 0.0  ;;  %v184_v12 = vld [vmem:[%s951_s0] sm:$0xff]  ;;  %s655_s0 = smov [#allocation2]  }
  0x1f   :  { %607 = vmatpush3.bf16.msra.mxu1 %v606_v22  ;;  %577 = vmatprep.subr.bf16.mxu0 %v576_v26  ;;  %v616_v53 = vpack.c.bf16 %v272_v52, %v271_v51  ;;  %v256_v56 = vld [vmem:[%s954_s3 + $0x178] sm:$0xff]  ;;  %v440_v60 = vsel %vm438_vm2, 0.0, %v653_v59  ;;  %s460_s22 = sshll.u32 %s655_s0, 4  ;;  %s461_s22 = int_to_ptr.vmem [resolvable:$true] %s460_s22 }
  0x20   :  { %609 = vmatprep.subr.bf16.mxu1 %v608_v31  ;;  %v618_v57 = vpack.c.bf16 %v256_v56, %v255_v55  ;;  %v442_v61 = vsel %vm441_vm1, %v440_v60, 0.0  ;;  %s628_s23 = scalar_lea.vmem %s461_s22, 32  ;;  %p633_p1 = scmp.lt.s32.totalorder %s461_s22, %s461_s22 }
  0x21   :  { %443 = vadd.xlane.f32.xlu0 %v442_v61  ;;  %p629_p0 = scmp.ne.s32.totalorder %s461_s22, %s628_s23  ;;  %p634_p2 = scmp.lt.s32.totalorder %s628_s23, %s628_s23 }
  0x22   :  { %579 = vmatpush3.bf16.msra.mxu0 %v578_v27 }
  0x23   :  { %581 = vmatprep.subr.bf16.mxu0 %v580_v36  ;;  %611 = vmatpush3.bf16.msra.mxu1 %v610_v35  ;;  %p635_p3 = por %p634_p2, %p633_p1 }
  0x24   :  { %613 = vmatprep.subr.bf16.mxu1 %v612_v44 }
  0x25   :  { %p636_p4 = pnand %p635_p3, %p629_p0 }
  0x26   :  { %583 = vmatpush3.bf16.msra.mxu0 %v582_v40 }
  0x27   :  { %585 = vmatprep.subr.bf16.mxu0 %v584_v49  ;;  %615 = vmatpush3.bf16.msra.mxu1 %v614_v48 }
  0x28   :  { %617 = vmatprep.subr.bf16.mxu1 %v616_v53 }
  0x2a   :  { %587 = vmatpush3.bf16.msra.mxu0 %v586_v54 }
  0x2b   :  { %619 = vmatpush3.bf16.msra.mxu1 %v618_v57 }
  0xae   :  { %v444_v29 = vpop.xlane.xlu0 %443 }
  0xaf   :  { %vm445_vm3 = vcmp.eq.f32.partialorder %v444_v29, 0.0 }
  0xb0   :  { %vm451_vm5 = vmand %vm445_vm3, %vm448_vm4 }
  0xe0   :  { %v108_v3 = vpop.f32.mrb[0].mxu0 }
  0xe1   :  { %v179_v5 = vpop.f32.mrb[0].mxu1  ;;  %v110_v6 = vpop.f32.mrb[1].mxu0 }
  0xe2   :  { %v189_v7 = vcombine.low %v108_v3, %v110_v6  ;;  %v181_v8 = vpop.f32.mrb[1].mxu1 }
  0xe3   :  { %v190_v9 = vcombine.low %v179_v5, %v181_v8 }
  0xe4   :  { %v197_v10 = vrot.slane %v189_v7, %v196_v4 }
  0xe5   :  { %v204_v11 = vrot.slane %v190_v9, %v196_v4 }
  0xe7   :  { %v205_v13 = vcombine.low %v197_v10, %v204_v11 }
  0xe9   :  { %v207_v14 = vadd.f32 %v205_v13, %v184_v12 }
  0xeb   :  { %624 = vtanh.f32 %v207_v14 }
  0xf5   :  { %v625_v15 = vpop.eup %624 }
  0xf6   :  { %v281_v16 = vrot.slane %v625_v15, %v196_v4  ;;  %v274_v17 = vcombine.high %v625_v15, %v625_v15 }
  0xf8   :  { %v289_v18 = vcombine.high %v281_v16, %v281_v16  ;;  %v288_v19 = vrot.slane %v274_v17, %v196_v4 }
  0xfa   :  { %359 = vmatprep.mubr.f32.mxu0 %v289_v18  ;;  %v290_v20 = vcombine.high %v288_v19, %v288_v19 }
  0xfb   :  { %360 = vmatmul.mubr.f32.vlgmr.msra.gmra.mrb[2].mxu0 %v281_v16 }
  0xfc   :  { %429 = vmatprep.mubr.f32.mxu1 %v290_v20 }
  0xfd   :  { %430 = vmatmul.mubr.f32.vlgmr.msra.gmra.mrb[2].mxu1 %v288_v19 }
 0x1ce   :  { %v502_v21 = vpop.f32.mrb[2].mxu0 }
 0x1cf   :  { %v503_v22 = vpop.f32.mrb[3].mxu0 }
 0x1d0   :  { %v504_v23 = vadd.f32 %v503_v22, %v502_v21  ;;  %v537_v24 = vpop.f32.mrb[2].mxu1 }
 0x1d1   :  { %v538_v25 = vpop.f32.mrb[3].mxu1 }
 0x1d2   :  { %v539_v26 = vadd.f32 %v538_v25, %v537_v24 }
 0x1d4   :  { %v432_v27 = vadd.f32 %v539_v26, %v504_v23 }
 0x1d6   :  { %626 = vtanh.f32 %v432_v27 }
 0x1e0   :  { %v627_v30 = vpop.eup %626 }
 0x1e1   :  { %v436_v31 = vmul.f32 10.0, %v627_v30 }
 0x1e3   :  { %v439_v32 = vsel %vm438_vm2, -inf, %v436_v31 }
 0x1e4   :  { %v452_v33 = vsel %vm451_vm5, 0.0, %v439_v32 }
 0x1e5   :  { %453 = vst.msk [vmem:[#allocation2] sm:$0x3] %vm441_vm1, %v452_v33 }
 0x1e6   :  { %639 = shalt.err (!%p636_p4)
}
 0x1e7   :  { %s640_s26 = scalar_lea.hbm %s956_s5, 32 }
 0x1e8   :  { %p641_p5 = scmp.ne.s32.totalorder %s956_s5, %s640_s26  ;;  %p644_p6 = scmp.lt.u32.totalorder %s640_s26, %s956_s5 }
 0x1ea   :  { %p646_p7 = pnand %p644_p6, %p641_p5 }
 0x1ec   :  { %649 = shalt.err (!%p646_p7)
}
 0x1ed   :  { %463 = dma.vmem_to_hbm [thread:$0]  %s461_s22, 32, %s956_s5, [#allocation3]  }
 0x1ee   :  { %650 = dma.done.wait [#allocation3], 32  }
 0x1ef   :  { %651 = vsyncadd [#allocation3], 4294967264 }
 0x1f0   :  { %467 = vsyncpa [#allocation3], 1 }

</bundles_post_ra>
